<compile_context>
chip_gen: v6e
topology: v6e:2x2x1
jax: 0.10.0
libtpu: 0.0.40
codegen_flags: <defaults>
</compile_context>

<pallas_src>
import functools

import jax
import jax.numpy as jnp
from jax import lax
from jax.experimental import pallas as pl
from jax.experimental.pallas import tpu as pltpu


def _fmix32(h):
    """murmur3 finalizer: full-avalanche 32-bit integer mix (uint32 in/out)."""
    h = h ^ (h >> 16)
    h = h * jnp.uint32(0x85EBCA6B)
    h = h ^ (h >> 13)
    h = h * jnp.uint32(0xC2B2AE35)
    h = h ^ (h >> 16)
    return h


def _dropout_kernel(seed_ref, x_ref, o_ref, *, threshold, scale, block_rows, lanes):
    # Per-element counter-based random bits (portable; no TPU-only PRNG prims).
    row = lax.broadcasted_iota(jnp.int32, (block_rows, lanes), 0)
    col = lax.broadcasted_iota(jnp.int32, (block_rows, lanes), 1)
    base_row = pl.program_id(0) * block_rows
    g = ((base_row + row) * lanes + col).astype(jnp.uint32)   # global element id

    # Non-additive seed mixing: hash the seed, xor into golden-ratio-spread ids,
    # then a full-avalanche finalizer.  Distinct seeds -> disjoint streams.
    seed_h = _fmix32(seed_ref[0].astype(jnp.uint32))
    bits = _fmix32((g * jnp.uint32(0x9E3779B1)) ^ seed_h)

    # Integer threshold compare: P(drop) = threshold / 2^32.
    keep = bits >= jnp.uint32(threshold)

    # Multiply / select in the native dtype (no f32 upcast round-trip).
    x = x_ref[...]
    scaled = x * jnp.asarray(scale, dtype=x.dtype)
    o_ref[...] = jnp.where(keep, scaled, jnp.zeros((), dtype=x.dtype))


def dropout_for_mc(x, p: float, seed: int = 0, dropout_flag: bool = True, *,
                   block_bytes: int = 2 * 1024 * 1024, donate_input: bool = False):
    """Pallas equivalent of F.dropout(x, p, training=True) (MC dropout)."""
    if not dropout_flag or p <= 0.0:
        return x
    if p >= 1.0:
        return jnp.zeros_like(x)

    orig_shape = x.shape
    dtype = x.dtype
    total = int(x.size)
    itemsize = jnp.dtype(dtype).itemsize

    # Lane-dense slab: widest power-of-two lane width (up to 1024) that still
    # leaves at least 8 sublane rows.  128 is the legal minimum, not the fast one.
    lanes = 128
    while lanes < 1024 and (lanes * 2) * 8 <= total:
        lanes *= 2
    rows = -(-total // lanes)
    rows = ((rows + 7) // 8) * 8                   # sublane-align
    padded = rows * lanes

    flat = x.reshape(-1)
    if padded != total:
        flat = jnp.concatenate([flat, jnp.zeros((padded - total,), dtype)])
    x2d = flat.reshape(rows, lanes)

    # Block rows: ~block_bytes per buffer, multiple of 8.  Double-buffered input
    # + output stays a few MiB — safe on v7x (64 MiB VMEM) as well as v5e/v6e.
    tr = max(8, (block_bytes // (lanes * itemsize)) // 8 * 8)
    tr = min(tr, rows)
    grid = (pl.cdiv(rows, tr),)

    threshold = min(int(round(float(p) * 2.0 ** 32)), 2 ** 32 - 1)
    scale = 1.0 / (1.0 - float(p))

    kernel = functools.partial(_dropout_kernel, threshold=threshold, scale=scale,
                               block_rows=tr, lanes=lanes)

    seed_arr = jnp.asarray([seed], dtype=jnp.int32)

    cost = pl.CostEstimate(flops=2 * padded, transcendentals=0,
                           bytes_accessed=2 * padded * itemsize)

    out2d = pl.pallas_call(
        kernel,
        out_shape=jax.ShapeDtypeStruct((rows, lanes), dtype),
        grid_spec=pltpu.PrefetchScalarGridSpec(
            num_scalar_prefetch=1,                 # seed lands in SMEM
            grid=grid,
            in_specs=[pl.BlockSpec((tr, lanes), lambda i, seed: (i, 0))],
            out_specs=pl.BlockSpec((tr, lanes), lambda i, seed: (i, 0)),
        ),
        compiler_params=pltpu.CompilerParams(
            dimension_semantics=("parallel",),     # tiles are independent → megacore
        ),
        cost_estimate=cost,
        input_output_aliases=({1: 0} if donate_input else {}),
    )(seed_arr, x2d)

    out = out2d.reshape(-1)
    if padded != total:
        out = out[:total]
    return out.reshape(orig_shape)


if __name__ == "__main__":
    key = jax.random.PRNGKey(0)
    # Small NCHW-style activation: B=2, C=4, H=16, W=16
    x = jax.random.normal(key, (2, 4, 16, 16), dtype=jnp.float32)

    p = 0.5  # dropout rate used by Model.drop / BackEnd's MC dropout
    y = dropout_for_mc(x, p=p, seed=1234, dropout_flag=True)
    y = jax.block_until_ready(y)

    # Sanity checks on dropout semantics.
    assert y.shape == x.shape and y.dtype == x.dtype
    zero_frac = float(jnp.mean(y == 0.0))
    nonzero = y != 0.0
    ratio_ok = bool(
        jnp.allclose(
            jnp.where(nonzero, y, 0.0),
            jnp.where(nonzero, x / (1.0 - p), 0.0),
            rtol=1e-5,
            atol=1e-5,
        )
    )
    assert ratio_ok, "surviving elements not scaled by 1/(1-p)"
    assert 0.35 < zero_frac < 0.65, f"drop fraction {zero_frac} far from p={p}"

    print("KERNEL_OK")
</pallas_src>

<mosaic_0001>
module attributes {stable_mosaic.version = 11 : i64} {
  func.func @_dropout_kernel(%arg0: i32, %arg1: memref<1xi32, #tpu.memory_space<smem>>, %arg2: memref<8x256xf32, #tpu.memory_space<vmem>>, %arg3: memref<8x256xf32, #tpu.memory_space<vmem>>) attributes {dimension_semantics = [#tpu.dimension_semantics<parallel>], iteration_bounds = array<i64: 1>, scalar_prefetch = 1 : i64, scratch_operands = 0 : i64, tpu.core_type = #tpu.core_type<tc>, window_params = [{transform_indices = @transform_0, window_bounds = array<i64: 8, 256>}, {transform_indices = @transform_1, window_bounds = array<i64: 8, 256>}]} {
    %0 = tpu.iota {dimensions = array<i32: 0>} : vector<8x256xi32>
    %1 = tpu.iota {dimensions = array<i32: 1>} : vector<8x256xi32>
    %c8_i32 = arith.constant 8 : i32
    %2 = arith.muli %arg0, %c8_i32 : i32
    %3 = vector.broadcast %2 : i32 to vector<8x256xi32>
    %4 = arith.addi %3, %0 : vector<8x256xi32>
    %c256_i32 = arith.constant 256 : i32
    %5 = vector.broadcast %c256_i32 : i32 to vector<8x256xi32>
    %6 = arith.muli %4, %5 : vector<8x256xi32>
    %7 = arith.addi %6, %1 : vector<8x256xi32>
    %c0 = arith.constant 0 : index
    %8 = memref.load %arg1[%c0] : memref<1xi32, #tpu.memory_space<smem>>
    %c16_i32 = arith.constant 16 : i32
    %9 = arith.shrui %8, %c16_i32 : i32
    %10 = arith.xori %8, %9 : i32
    %c-2048144789_i32 = arith.constant -2048144789 : i32
    %11 = arith.muli %10, %c-2048144789_i32 : i32
    %c13_i32 = arith.constant 13 : i32
    %12 = arith.shrui %11, %c13_i32 : i32
    %13 = arith.xori %11, %12 : i32
    %c-1028477387_i32 = arith.constant -1028477387 : i32
    %14 = arith.muli %13, %c-1028477387_i32 : i32
    %c16_i32_0 = arith.constant 16 : i32
    %15 = arith.shrui %14, %c16_i32_0 : i32
    %16 = arith.xori %14, %15 : i32
    %c-1640531535_i32 = arith.constant -1640531535 : i32
    %17 = vector.broadcast %c-1640531535_i32 : i32 to vector<8x256xi32>
    %18 = arith.muli %7, %17 : vector<8x256xi32>
    %19 = vector.broadcast %16 : i32 to vector<8x256xi32>
    %20 = arith.xori %18, %19 : vector<8x256xi32>
    %c16_i32_1 = arith.constant 16 : i32
    %21 = vector.broadcast %c16_i32_1 : i32 to vector<8x256xi32>
    %22 = arith.shrui %20, %21 : vector<8x256xi32>
    %23 = arith.xori %20, %22 : vector<8x256xi32>
    %c-2048144789_i32_2 = arith.constant -2048144789 : i32
    %24 = vector.broadcast %c-2048144789_i32_2 : i32 to vector<8x256xi32>
    %25 = arith.muli %23, %24 : vector<8x256xi32>
    %c13_i32_3 = arith.constant 13 : i32
    %26 = vector.broadcast %c13_i32_3 : i32 to vector<8x256xi32>
    %27 = arith.shrui %25, %26 : vector<8x256xi32>
    %28 = arith.xori %25, %27 : vector<8x256xi32>
    %c-1028477387_i32_4 = arith.constant -1028477387 : i32
    %29 = vector.broadcast %c-1028477387_i32_4 : i32 to vector<8x256xi32>
    %30 = arith.muli %28, %29 : vector<8x256xi32>
    %c16_i32_5 = arith.constant 16 : i32
    %31 = vector.broadcast %c16_i32_5 : i32 to vector<8x256xi32>
    %32 = arith.shrui %30, %31 : vector<8x256xi32>
    %33 = arith.xori %30, %32 : vector<8x256xi32>
    %c-2147483648_i32 = arith.constant -2147483648 : i32
    %34 = vector.broadcast %c-2147483648_i32 : i32 to vector<8x256xi32>
    %35 = arith.cmpi uge, %33, %34 : vector<8x256xi32>
    %c0_6 = arith.constant 0 : index
    %c0_7 = arith.constant 0 : index
    %36 = vector.load %arg2[%c0_6, %c0_7] : memref<8x256xf32, #tpu.memory_space<vmem>>, vector<8x256xf32>
    %cst = arith.constant 2.000000e+00 : f32
    %37 = vector.broadcast %cst : f32 to vector<8x256xf32>
    %38 = arith.mulf %36, %37 : vector<8x256xf32>
    %cst_8 = arith.constant 0.000000e+00 : f32
    %39 = vector.broadcast %cst_8 : f32 to vector<8x256xf32>
    %40 = arith.select %35, %38, %39 : vector<8x256xi1>, vector<8x256xf32>
    %c0_9 = arith.constant 0 : index
    %c0_10 = arith.constant 0 : index
    %41 = vector.load %arg3[%c0_9, %c0_10] : memref<8x256xf32, #tpu.memory_space<vmem>>, vector<8x256xf32>
    tpu.vector_store %arg3[%c0_9, %c0_10], %40 {strides = array<i32>} : memref<8x256xf32, #tpu.memory_space<vmem>>, vector<8x256xf32>,
    return
  }
  func.func @transform_0(%arg0: i32, %arg1: memref<1xi32, #tpu.memory_space<smem>>) -> (i32, i32) {
    %c0_i32 = arith.constant 0 : i32
    %c0_i32_0 = arith.constant 0 : i32
    return %arg0, %c0_i32 : i32, i32
  }
  func.func @transform_1(%arg0: i32, %arg1: memref<1xi32, #tpu.memory_space<smem>>) -> (i32, i32) {
    %c0_i32 = arith.constant 0 : i32
    %c0_i32_0 = arith.constant 0 : i32
    return %arg0, %c0_i32 : i32, i32
  }
}

</mosaic_0001>

<bundles_post_ra>
// kernel: tpu_custom_call.1
= control target key start
LH: loop header
LB: loop body
LE: loop exit
PB: predicated region body
PF: predicated region fallthrough
CT: control target
= control target key end

     0   :  { %8 = vsyncpa [#allocation5], 0  ;;  %s164_s0 = inlined_call_operand.<no memory space> [shape: s32[1], index: 0, kind: input, shape index: {}]   ;;  %s165_s1 = inlined_call_operand.hbm [shape: f32[8,256], index: 1, kind: input, shape index: {}]   ;;  %s166_s2 = inlined_call_operand.hbm [shape: f32[8,256], index: 2, kind: output, shape index: {}]  }
   0x1   :  { %9 = vsyncpa [#allocation6], 0  ;;  %s135_s9 = smov [#allocation4]  }
   0x2   :  { %s16_s10 = sshll.u32 %s135_s9, 4  ;;  %s17_s10 = int_to_ptr.vmem [resolvable:$true] %s16_s10 }
   0x3   :  { %s99_s11 = scalar_lea.vmem %s17_s10, 256  ;;  %p104_p1 = scmp.lt.s32.totalorder %s17_s10, %s17_s10 }
   0x4   :  { %p100_p0 = scmp.ne.s32.totalorder %s17_s10, %s99_s11  ;;  %p105_p2 = scmp.lt.s32.totalorder %s99_s11, %s99_s11 }
   0x6   :  { %p106_p3 = por %p105_p2, %p104_p1 }
   0x8   :  { %p107_p4 = pnand %p106_p3, %p100_p0 }
   0xa   :  { %110 = shalt.err (!%p107_p4)
}
   0xb   :  { %19 = dma.hbm_to_vmem [thread:$0]  %s165_s1, 256, %s17_s10, [#allocation5]  }
   0xc   :  { %131 = dma.done.wait [#allocation5], 256  }
   0xd   :  { %132 = vsyncadd [#allocation5], 4294967040  ;;  %v23_v0 = vlaneseq  ;;  %s35_s16 = sshrl.u32 %s164_s0, 16  ;;  %v66_v23 = vld [vmem:[#allocation4] sm:$0xff]  ;;  %v67_v25 = vld [vmem:[#allocation4 + $0x8] sm:$0xff] }
   0xe   :  { %s36_s19 = sxor.u32 %s35_s16, %s164_s0  ;;  %v68_v28 = vmul.f32 2.0, %v66_v23  ;;  %v69_v29 = vmul.f32 2.0, %v67_v25  ;;  %s136_s0 = smov [#allocation7]  }
   0xf   :  { %v24_v1 = vshrl.u32 %v23_v0, 7  ;;  %v26_v2 = vand.u32 127, %v23_v0  ;;  %s37_s20 = smul.u32 2246822507, %s36_s19  ;;  %s80_s25 = sshll.u32 %s136_s0, 4  ;;  %s81_s25 = int_to_ptr.vmem [resolvable:$true] %s80_s25 }
  0x10   :  { %s111_s26 = scalar_lea.vmem %s81_s25, 256  ;;  %p116_p6 = scmp.lt.s32.totalorder %s81_s25, %s81_s25 }
  0x11   :  { %v31_v3 = vmul.u32 256, %v24_v1  ;;  %s38_s21 = sshrl.u32 %s37_s20, 13  ;;  %v27_v4 = vadd.s32 128, %v26_v2  ;;  %p112_p5 = scmp.ne.s32.totalorder %s81_s25, %s111_s26 }
  0x12   :  { %s39_s22 = sxor.u32 %s38_s21, %s37_s20  ;;  %p117_p7 = scmp.lt.s32.totalorder %s111_s26, %s111_s26 }
  0x13   :  { %v32_v5 = vadd.s32 %v31_v3, %v26_v2  ;;  %s40_s1 = smul.u32 3266489909, %s39_s22  ;;  %v33_v6 = vadd.s32 %v31_v3, %v27_v4 }
  0x14   :  { %p118_p8 = por %p117_p7, %p116_p6 }
  0x15   :  { %s41_s23 = sshrl.u32 %s40_s1, 16  ;;  %v43_v7 = vmul.u32 2654435761, %v32_v5  ;;  %v44_v8 = vmul.u32 2654435761, %v33_v6 }
  0x16   :  { %s42_s24 = sxor.u32 %s41_s23, %s40_s1  ;;  %p119_p9 = pnand %p118_p8, %p112_p5 }
  0x17   :  { %v45_v9 = vstv %s42_s24 }
  0x18   :  { %v46_v10 = vxor.u32 %v45_v9, %v43_v7  ;;  %v47_v11 = vxor.u32 %v45_v9, %v44_v8 }
  0x1a   :  { %v48_v12 = vshrl.u32 %v46_v10, 16  ;;  %v49_v13 = vshrl.u32 %v47_v11, 16 }
  0x1c   :  { %v50_v14 = vxor.u32 %v48_v12, %v46_v10  ;;  %v51_v15 = vxor.u32 %v49_v13, %v47_v11 }
  0x1e   :  { %v52_v16 = vmul.u32 2246822507, %v50_v14  ;;  %v53_v17 = vmul.u32 2246822507, %v51_v15 }
  0x20   :  { %v54_v18 = vshrl.u32 %v52_v16, 13  ;;  %v55_v19 = vshrl.u32 %v53_v17, 13 }
  0x22   :  { %v56_v20 = vxor.u32 %v54_v18, %v52_v16  ;;  %v57_v21 = vxor.u32 %v55_v19, %v53_v17 }
  0x24   :  { %v58_v22 = vmul.u32 3266489909, %v56_v20  ;;  %v59_v24 = vmul.u32 3266489909, %v57_v21 }
  0x26   :  { %v60_v26 = vshrl.u32 %v58_v22, 16  ;;  %v61_v27 = vshrl.u32 %v59_v24, 16 }
  0x28   :  { %v62_v30 = vxor.u32 %v60_v26, %v58_v22  ;;  %v63_v31 = vxor.u32 %v61_v27, %v59_v24 }
  0x2a   :  { %vm64_vm0 = vcmp.ge.u32.totalorder %v62_v30, 2147483648  ;;  %vm65_vm1 = vcmp.ge.u32.totalorder %v63_v31, 2147483648 }
  0x2b   :  { %v70_v32 = vsel %vm64_vm0, %v68_v28, 0.0  ;;  %v71_v33 = vsel %vm65_vm1, %v69_v29, 0.0 }
  0x2c   :  { %72 = vst [vmem:[#allocation7] sm:$0xff] %v70_v32  ;;  %73 = vst [vmem:[#allocation7 + $0x8] sm:$0xff] %v71_v33 }
  0x2d   :  { %122 = shalt.err (!%p119_p9)
}
  0x2e   :  { %83 = dma.vmem_to_hbm [thread:$0]  %s81_s25, 256, %s166_s2, [#allocation6]  }
  0x2f   :  { %133 = dma.done.wait [#allocation6], 256  }
  0x30   :  { %134 = vsyncadd [#allocation6], 4294967040 }
  0x31   :  { %87 = vsyncpa [#allocation5], 1 }
  0x32   :  { %88 = vsyncpa [#allocation6], 1 }

</bundles_post_ra>
